<compile_context>
chip_gen: v5e
topology: v5e:2x2
jax: 0.10.0
libtpu: 0.0.40
codegen_flags: <defaults>
</compile_context>

<pallas_src>
import functools

import jax
import jax.numpy as jnp
from jax.experimental import pallas as pl
from jax.experimental.pallas import tpu as pltpu


# --------------------------------------------------------------------------- #
# Kernel
# --------------------------------------------------------------------------- #
def _timeblock_kernel(x_ref, w_ref, b_ref, o_ref, *, k, c_in, c_out, t_out,
                      approx_gate):
    """One grid step: `rows` (batch*node) rows, all temporal positions.

    x_ref : (rows, T*C_in)       time-major-flattened activations (compute dtype)
    w_ref : (k*C_in, 2*C_out)    fused weights [W1+W3 | W2]       (resident)
    b_ref : (1, 2*C_out)         fused bias    [b1+b3 | b2]       (f32, resident)
    o_ref : (rows, T_out*C_out)  lane/sublane-dense output slab
    """
    rows = x_ref.shape[0]
    w = w_ref[...]                                           # loop-invariant load
    bias = jnp.broadcast_to(b_ref[...], (rows, 2 * c_out))   # hoisted broadcast

    # T_out is small and static -> full unroll (scheduler sees all iterations).
    for p in range(t_out):
        # Implicit im2col: in the (T*C_in)-flattened layout the temporal window
        # for output position p is a contiguous column slice.
        lhs = x_ref[:, p * c_in:(p + k) * c_in]              # (rows, k*C_in)
        # One whole-tile MXU pass: M=rows, K=k*C_in, N=2*C_out, f32 accumulate.
        y = jnp.dot(lhs, w, preferred_element_type=jnp.float32) + bias
        lin = y[:, :c_out]                                   # conv1 + conv3 (folded)
        z = y[:, c_out:]                                     # conv2 pre-activation
        if approx_gate:
            # sigmoid via EUP exp + approximate reciprocal (divide off the VALU).
            gate = pl.reciprocal(1.0 + jnp.exp(-z), approx=True)
        else:
            gate = jax.nn.sigmoid(z)                         # exact, for f32 checks
        t = lin + gate
        # leaky_relu (slope 0.01) as mul+max; dense (rows, C_out) store,
        # lane-offset p*C_out is 128-aligned when C_out % 128 == 0.
        o_ref[:, p * c_out:(p + 1) * c_out] = (
            jnp.maximum(t, 0.01 * t).astype(o_ref.dtype))


# --------------------------------------------------------------------------- #
# Wrapper
# --------------------------------------------------------------------------- #
def _tpu_generation_info():
    """Return (vmem_capacity_bytes, tensorcores_per_chip) with safe fallbacks."""
    kind = ""
    try:
        kind = jax.devices()[0].device_kind.lower()
    except Exception:
        pass
    # v7x / v4 / v5p have 2 TensorCores per chip; v5e / v6e have 1.
    n_cores = 2 if any(tag in kind for tag in ("v7", "v4", "v5p")) else 1
    vmem_cap = (64 << 20) if "v7" in kind else (128 << 20)
    try:
        vmem_cap = int(pltpu.get_tpu_info().vmem_capacity_bytes)
    except Exception:
        pass
    return vmem_cap, n_cores


@functools.partial(
    jax.jit,
    static_argnames=("k", "rows", "n_blocks", "compute_dtype", "out_dtype",
                     "vmem_limit", "approx_gate"))
def _timeblock_call(x, w1, b1, w2, b2, w3, b3, *, k, rows, n_blocks,
                    compute_dtype, out_dtype, vmem_limit, approx_gate):
    B, N, T, C_in = x.shape
    C_out = w1.shape[0]
    T_out = T - k + 1
    BN = B * N
    BN_pad = rows * n_blocks

    # --- weight prep: all linear folding done once, outside the kernel -------
    def kcio(w):  # (C_out, C_in, 1, k) -> (k*C_in, C_out), row index = j*C_in + c
        return jnp.transpose(w[:, :, 0, :], (2, 1, 0)).reshape(k * C_in, C_out)

    w_cat = jnp.concatenate([kcio(w1) + kcio(w3), kcio(w2)],
                            axis=-1).astype(compute_dtype)        # (k*C_in, 2*C_out)
    b_cat = jnp.concatenate([b1 + b3, b2]).reshape(1, 2 * C_out).astype(jnp.float32)

    # --- activation layout: free row-major flatten, no host-side im2col ------
    x2d = x.reshape(BN, T * C_in).astype(compute_dtype)
    if BN_pad != BN:
        x2d = jnp.pad(x2d, ((0, BN_pad - BN), (0, 0)))

    kernel = functools.partial(_timeblock_kernel, k=k, c_in=C_in, c_out=C_out,
                               t_out=T_out, approx_gate=approx_gate)

    out2d = pl.pallas_call(
        kernel,
        out_shape=jax.ShapeDtypeStruct((BN_pad, T_out * C_out), out_dtype),
        grid_spec=pltpu.PrefetchScalarGridSpec(
            num_scalar_prefetch=0,
            grid=(n_blocks,),
            in_specs=[
                pl.BlockSpec((rows, T * C_in), lambda i: (i, 0)),        # streamed
                pl.BlockSpec((k * C_in, 2 * C_out), lambda i: (0, 0)),   # resident
                pl.BlockSpec((1, 2 * C_out), lambda i: (0, 0)),          # resident
            ],
            out_specs=pl.BlockSpec((rows, T_out * C_out), lambda i: (i, 0)),
        ),
        compiler_params=pltpu.CompilerParams(
            dimension_semantics=("parallel",),
            vmem_limit_bytes=vmem_limit),
    )(x2d, w_cat, b_cat)

    # Free row-major reshape back; padded rows are dropped.
    return out2d[:BN].reshape(B, N, T_out, C_out)


def timeblock_forward(x, w1, b1, w2, b2, w3, b3, *, kernel_size=3,
                      rows_per_block=1024, compute_dtype=jnp.bfloat16,
                      out_dtype=None):
    """x: (B, N, T, C_in); w*: (C_out, C_in, 1, k); b*: (C_out,)."""
    B, N, T, C_in = x.shape
    C_out = w1.shape[0]
    k = kernel_size
    T_out = T - k + 1
    BN = B * N

    compute_dtype = jnp.dtype(compute_dtype)
    out_dtype = jnp.dtype(x.dtype if out_dtype is None else out_dtype)

    # --- generation-aware row-block sizing ------------------------------------
    vmem_cap, n_cores = _tpu_generation_info()
    budget = (40 << 20) if vmem_cap <= (64 << 20) else (96 << 20)
    itm_c = compute_dtype.itemsize
    itm_o = out_dtype.itemsize
    fixed = k * C_in * 2 * C_out * itm_c + 2 * C_out * 4 + (2 << 20)   # weights+bias+slack
    per_row = 2 * (T * C_in * itm_c + T_out * C_out * itm_o)           # dbl-buffered tiles
    max_rows_vmem = max(8, int((budget - fixed) // max(per_row, 1)) // 8 * 8)

    per_core = -(-BN // n_cores)            # on 1-TC chips: the whole thing (no /2 clamp)
    per_core = -(-per_core // 8) * 8        # round up to sublane multiple
    rows = max(8, min(rows_per_block, max_rows_vmem, per_core))
    rows = max(8, (rows // 8) * 8)

    n_blocks = -(-BN // rows)
    if n_cores > 1 and n_blocks % n_cores != 0:
        n_blocks = -(-n_blocks // n_cores) * n_cores   # no idle tail TensorCore

    est = fixed + rows * per_row
    vmem_limit = None
    if est > (24 << 20):
        vmem_limit = int(min(est + (8 << 20), budget + (8 << 20)))

    approx_gate = compute_dtype != jnp.dtype(jnp.float32)

    return _timeblock_call(x, w1, b1, w2, b2, w3, b3, k=k, rows=rows,
                           n_blocks=n_blocks, compute_dtype=compute_dtype,
                           out_dtype=out_dtype, vmem_limit=vmem_limit,
                           approx_gate=approx_gate)


# --------------------------------------------------------------------------- #
# Pure-JAX reference (mirrors the PyTorch forward, no folding, f32)
# --------------------------------------------------------------------------- #
def _reference(x, w1, b1, w2, b2, w3, b3, k):
    B, N, T, C_in = x.shape
    T_out = T - k + 1
    x_unf = jnp.concatenate([x[:, :, j:j + T_out, :] for j in range(k)], axis=-1)

    def conv(w, b):
        wf = jnp.transpose(w[:, :, 0, :], (2, 1, 0)).reshape(k * C_in, -1)
        return jnp.einsum("bntc,co->bnto", x_unf, wf,
                          precision=jax.lax.Precision.HIGHEST) + b

    temp = conv(w1, b1) + jax.nn.sigmoid(conv(w2, b2)) + conv(w3, b3)
    return jnp.where(temp >= 0, temp, 0.01 * temp)


if __name__ == "__main__":
    key = jax.random.PRNGKey(0)
    B, N, T = 2, 8, 12          # batch, num_nodes, num_timesteps
    C_in, C_out, K = 4, 128, 3  # in_channels, out_channels, kernel_size

    ks = jax.random.split(key, 7)
    x = jax.random.normal(ks[0], (B, N, T, C_in), dtype=jnp.float32)

    bound = 1.0 / (C_in * K) ** 0.5   # matches PyTorch Conv2d default init scale
    def uw(k_): return jax.random.uniform(k_, (C_out, C_in, 1, K), jnp.float32, -bound, bound)
    def ub(k_): return jax.random.uniform(k_, (C_out,), jnp.float32, -bound, bound)

    w1, w2, w3 = uw(ks[1]), uw(ks[2]), uw(ks[3])
    b1, b2, b3 = ub(ks[4]), ub(ks[5]), ub(ks[6])

    ref = _reference(x, w1, b1, w2, b2, w3, b3, K)

    # f32 compute path (exact sigmoid): tight semantic check of the fused kernel.
    out32 = timeblock_forward(x, w1, b1, w2, b2, w3, b3, kernel_size=K,
                              compute_dtype=jnp.float32)
    out32 = jax.block_until_ready(out32)
    assert out32.shape == (B, N, T - K + 1, C_out), out32.shape
    err32 = float(jnp.max(jnp.abs(out32 - ref)))
    assert err32 < 2e-3, f"f32 mismatch vs reference: {err32}"

    # bf16 streaming + bf16 writeback (recommended deployment mode: halves the
    # HBM writes this kernel is bound by).
    out16 = timeblock_forward(x, w1, b1, w2, b2, w3, b3, kernel_size=K,
                              compute_dtype=jnp.bfloat16, out_dtype=jnp.bfloat16)
    out16 = jax.block_until_ready(out16)
    err16 = float(jnp.max(jnp.abs(out16.astype(jnp.float32) - ref)))
    assert err16 < 1e-1, f"bf16 mismatch vs reference: {err16}"

    print("KERNEL_OK")
</pallas_src>

<mosaic_0001>
module attributes {stable_mosaic.version = 11 : i64} {
  func.func @_timeblock_kernel(%arg0: i32, %arg1: memref<16x48xf32, #tpu.memory_space<vmem>>, %arg2: memref<12x256xf32, #tpu.memory_space<vmem>>, %arg3: memref<1x256xf32, #tpu.memory_space<vmem>>, %arg4: memref<16x1280xf32, #tpu.memory_space<vmem>>) attributes {dimension_semantics = [#tpu.dimension_semantics<parallel>], iteration_bounds = array<i64: 1>, scalar_prefetch = 0 : i64, scratch_operands = 0 : i64, tpu.core_type = #tpu.core_type<tc>, window_params = [{transform_indices = @transform_0, window_bounds = array<i64: 16, 48>}, {pipeline_mode = #tpu.pipeline_mode<synchronous>, transform_indices = @transform_1, window_bounds = array<i64: 12, 256>}, {pipeline_mode = #tpu.pipeline_mode<synchronous>, transform_indices = @transform_2, window_bounds = array<i64: 1, 256>}, {transform_indices = @transform_3, window_bounds = array<i64: 16, 1280>}]} {
    %c0 = arith.constant 0 : index
    %c0_0 = arith.constant 0 : index
    %0 = vector.load %arg2[%c0, %c0_0] : memref<12x256xf32, #tpu.memory_space<vmem>>, vector<12x256xf32>
    %c0_1 = arith.constant 0 : index
    %c0_2 = arith.constant 0 : index
    %1 = vector.load %arg3[%c0_1, %c0_2] : memref<1x256xf32, #tpu.memory_space<vmem>>, vector<1x256xf32>
    %2 = vector.shape_cast %1 : vector<1x256xf32> to vector<1x256xf32>
    %3 = vector.broadcast %2 : vector<1x256xf32> to vector<16x256xf32>
    %c0_3 = arith.constant 0 : index
    %c0_4 = arith.constant 0 : index
    %4 = vector.load %arg1[%c0_3, %c0_4] : memref<16x48xf32, #tpu.memory_space<vmem>>, vector<16x12xf32>
    %cst = arith.constant dense<0.000000e+00> : vector<16x256xf32>
    %5 = tpu.matmul %4, %0, %cst {dimension_numbers = #tpu.dot_dimension_numbers<[1], [0], [0], [1], [0, 0, 1, 1], [], []>} : vector<16x12xf32>, vector<12x256xf32>, vector<16x256xf32> -> vector<16x256xf32>
    %6 = arith.addf %5, %3 : vector<16x256xf32>
    %7 = vector.extract_strided_slice %6 {offsets = [0, 0], sizes = [16, 128], strides = [1, 1]} : vector<16x256xf32> to vector<16x128xf32>
    %8 = vector.extract_strided_slice %6 {offsets = [0, 128], sizes = [16, 128], strides = [1, 1]} : vector<16x256xf32> to vector<16x128xf32>
    %9 = arith.negf %8 : vector<16x128xf32>
    %10 = math.exp %9 : vector<16x128xf32>
    %cst_5 = arith.constant 1.000000e+00 : f32
    %11 = vector.broadcast %cst_5 : f32 to vector<16x128xf32>
    %12 = arith.addf %11, %10 : vector<16x128xf32>
    %13 = arith.divf %11, %12 : vector<16x128xf32>
    %14 = arith.addf %7, %13 : vector<16x128xf32>
    %cst_6 = arith.constant 0.00999999977 : f32
    %15 = vector.broadcast %cst_6 : f32 to vector<16x128xf32>
    %16 = arith.mulf %15, %14 : vector<16x128xf32>
    %17 = arith.maximumf %14, %16 : vector<16x128xf32>
    %c0_7 = arith.constant 0 : index
    %c0_8 = arith.constant 0 : index
    %18 = vector.load %arg4[%c0_7, %c0_8] : memref<16x1280xf32, #tpu.memory_space<vmem>>, vector<16x128xf32>
    tpu.vector_store %arg4[%c0_7, %c0_8], %17 {strides = array<i32>} : memref<16x1280xf32, #tpu.memory_space<vmem>>, vector<16x128xf32>,
    %c0_9 = arith.constant 0 : index
    %c4 = arith.constant 4 : index
    %19 = vector.load %arg1[%c0_9, %c4] : memref<16x48xf32, #tpu.memory_space<vmem>>, vector<16x12xf32>
    %cst_10 = arith.constant dense<0.000000e+00> : vector<16x256xf32>
    %20 = tpu.matmul %19, %0, %cst_10 {dimension_numbers = #tpu.dot_dimension_numbers<[1], [0], [0], [1], [0, 0, 1, 1], [], []>} : vector<16x12xf32>, vector<12x256xf32>, vector<16x256xf32> -> vector<16x256xf32>
    %21 = arith.addf %20, %3 : vector<16x256xf32>
    %22 = vector.extract_strided_slice %21 {offsets = [0, 0], sizes = [16, 128], strides = [1, 1]} : vector<16x256xf32> to vector<16x128xf32>
    %23 = vector.extract_strided_slice %21 {offsets = [0, 128], sizes = [16, 128], strides = [1, 1]} : vector<16x256xf32> to vector<16x128xf32>
    %24 = arith.negf %23 : vector<16x128xf32>
    %25 = math.exp %24 : vector<16x128xf32>
    %cst_11 = arith.constant 1.000000e+00 : f32
    %26 = vector.broadcast %cst_11 : f32 to vector<16x128xf32>
    %27 = arith.addf %26, %25 : vector<16x128xf32>
    %28 = arith.divf %26, %27 : vector<16x128xf32>
    %29 = arith.addf %22, %28 : vector<16x128xf32>
    %cst_12 = arith.constant 0.00999999977 : f32
    %30 = vector.broadcast %cst_12 : f32 to vector<16x128xf32>
    %31 = arith.mulf %30, %29 : vector<16x128xf32>
    %32 = arith.maximumf %29, %31 : vector<16x128xf32>
    %c0_13 = arith.constant 0 : index
    %c128 = arith.constant 128 : index
    %33 = vector.load %arg4[%c0_13, %c128] : memref<16x1280xf32, #tpu.memory_space<vmem>>, vector<16x128xf32>
    tpu.vector_store %arg4[%c0_13, %c128], %32 {strides = array<i32>} : memref<16x1280xf32, #tpu.memory_space<vmem>>, vector<16x128xf32>,
    %c0_14 = arith.constant 0 : index
    %c8 = arith.constant 8 : index
    %34 = vector.load %arg1[%c0_14, %c8] : memref<16x48xf32, #tpu.memory_space<vmem>>, vector<16x12xf32>
    %cst_15 = arith.constant dense<0.000000e+00> : vector<16x256xf32>
    %35 = tpu.matmul %34, %0, %cst_15 {dimension_numbers = #tpu.dot_dimension_numbers<[1], [0], [0], [1], [0, 0, 1, 1], [], []>} : vector<16x12xf32>, vector<12x256xf32>, vector<16x256xf32> -> vector<16x256xf32>
    %36 = arith.addf %35, %3 : vector<16x256xf32>
    %37 = vector.extract_strided_slice %36 {offsets = [0, 0], sizes = [16, 128], strides = [1, 1]} : vector<16x256xf32> to vector<16x128xf32>
    %38 = vector.extract_strided_slice %36 {offsets = [0, 128], sizes = [16, 128], strides = [1, 1]} : vector<16x256xf32> to vector<16x128xf32>
    %39 = arith.negf %38 : vector<16x128xf32>
    %40 = math.exp %39 : vector<16x128xf32>
    %cst_16 = arith.constant 1.000000e+00 : f32
    %41 = vector.broadcast %cst_16 : f32 to vector<16x128xf32>
    %42 = arith.addf %41, %40 : vector<16x128xf32>
    %43 = arith.divf %41, %42 : vector<16x128xf32>
    %44 = arith.addf %37, %43 : vector<16x128xf32>
    %cst_17 = arith.constant 0.00999999977 : f32
    %45 = vector.broadcast %cst_17 : f32 to vector<16x128xf32>
    %46 = arith.mulf %45, %44 : vector<16x128xf32>
    %47 = arith.maximumf %44, %46 : vector<16x128xf32>
    %c0_18 = arith.constant 0 : index
    %c256 = arith.constant 256 : index
    %48 = vector.load %arg4[%c0_18, %c256] : memref<16x1280xf32, #tpu.memory_space<vmem>>, vector<16x128xf32>
    tpu.vector_store %arg4[%c0_18, %c256], %47 {strides = array<i32>} : memref<16x1280xf32, #tpu.memory_space<vmem>>, vector<16x128xf32>,
    %c0_19 = arith.constant 0 : index
    %c12 = arith.constant 12 : index
    %49 = vector.load %arg1[%c0_19, %c12] : memref<16x48xf32, #tpu.memory_space<vmem>>, vector<16x12xf32>
    %cst_20 = arith.constant dense<0.000000e+00> : vector<16x256xf32>
    %50 = tpu.matmul %49, %0, %cst_20 {dimension_numbers = #tpu.dot_dimension_numbers<[1], [0], [0], [1], [0, 0, 1, 1], [], []>} : vector<16x12xf32>, vector<12x256xf32>, vector<16x256xf32> -> vector<16x256xf32>
    %51 = arith.addf %50, %3 : vector<16x256xf32>
    %52 = vector.extract_strided_slice %51 {offsets = [0, 0], sizes = [16, 128], strides = [1, 1]} : vector<16x256xf32> to vector<16x128xf32>
    %53 = vector.extract_strided_slice %51 {offsets = [0, 128], sizes = [16, 128], strides = [1, 1]} : vector<16x256xf32> to vector<16x128xf32>
    %54 = arith.negf %53 : vector<16x128xf32>
    %55 = math.exp %54 : vector<16x128xf32>
    %cst_21 = arith.constant 1.000000e+00 : f32
    %56 = vector.broadcast %cst_21 : f32 to vector<16x128xf32>
    %57 = arith.addf %56, %55 : vector<16x128xf32>
    %58 = arith.divf %56, %57 : vector<16x128xf32>
    %59 = arith.addf %52, %58 : vector<16x128xf32>
    %cst_22 = arith.constant 0.00999999977 : f32
    %60 = vector.broadcast %cst_22 : f32 to vector<16x128xf32>
    %61 = arith.mulf %60, %59 : vector<16x128xf32>
    %62 = arith.maximumf %59, %61 : vector<16x128xf32>
    %c0_23 = arith.constant 0 : index
    %c384 = arith.constant 384 : index
    %63 = vector.load %arg4[%c0_23, %c384] : memref<16x1280xf32, #tpu.memory_space<vmem>>, vector<16x128xf32>
    tpu.vector_store %arg4[%c0_23, %c384], %62 {strides = array<i32>} : memref<16x1280xf32, #tpu.memory_space<vmem>>, vector<16x128xf32>,
    %c0_24 = arith.constant 0 : index
    %c16 = arith.constant 16 : index
    %64 = vector.load %arg1[%c0_24, %c16] : memref<16x48xf32, #tpu.memory_space<vmem>>, vector<16x12xf32>
    %cst_25 = arith.constant dense<0.000000e+00> : vector<16x256xf32>
    %65 = tpu.matmul %64, %0, %cst_25 {dimension_numbers = #tpu.dot_dimension_numbers<[1], [0], [0], [1], [0, 0, 1, 1], [], []>} : vector<16x12xf32>, vector<12x256xf32>, vector<16x256xf32> -> vector<16x256xf32>
    %66 = arith.addf %65, %3 : vector<16x256xf32>
    %67 = vector.extract_strided_slice %66 {offsets = [0, 0], sizes = [16, 128], strides = [1, 1]} : vector<16x256xf32> to vector<16x128xf32>
    %68 = vector.extract_strided_slice %66 {offsets = [0, 128], sizes = [16, 128], strides = [1, 1]} : vector<16x256xf32> to vector<16x128xf32>
    %69 = arith.negf %68 : vector<16x128xf32>
    %70 = math.exp %69 : vector<16x128xf32>
    %cst_26 = arith.constant 1.000000e+00 : f32
    %71 = vector.broadcast %cst_26 : f32 to vector<16x128xf32>
    %72 = arith.addf %71, %70 : vector<16x128xf32>
    %73 = arith.divf %71, %72 : vector<16x128xf32>
    %74 = arith.addf %67, %73 : vector<16x128xf32>
    %cst_27 = arith.constant 0.00999999977 : f32
    %75 = vector.broadcast %cst_27 : f32 to vector<16x128xf32>
    %76 = arith.mulf %75, %74 : vector<16x128xf32>
    %77 = arith.maximumf %74, %76 : vector<16x128xf32>
    %c0_28 = arith.constant 0 : index
    %c512 = arith.constant 512 : index
    %78 = vector.load %arg4[%c0_28, %c512] : memref<16x1280xf32, #tpu.memory_space<vmem>>, vector<16x128xf32>
    tpu.vector_store %arg4[%c0_28, %c512], %77 {strides = array<i32>} : memref<16x1280xf32, #tpu.memory_space<vmem>>, vector<16x128xf32>,
    %c0_29 = arith.constant 0 : index
    %c20 = arith.constant 20 : index
    %79 = vector.load %arg1[%c0_29, %c20] : memref<16x48xf32, #tpu.memory_space<vmem>>, vector<16x12xf32>
    %cst_30 = arith.constant dense<0.000000e+00> : vector<16x256xf32>
    %80 = tpu.matmul %79, %0, %cst_30 {dimension_numbers = #tpu.dot_dimension_numbers<[1], [0], [0], [1], [0, 0, 1, 1], [], []>} : vector<16x12xf32>, vector<12x256xf32>, vector<16x256xf32> -> vector<16x256xf32>
    %81 = arith.addf %80, %3 : vector<16x256xf32>
    %82 = vector.extract_strided_slice %81 {offsets = [0, 0], sizes = [16, 128], strides = [1, 1]} : vector<16x256xf32> to vector<16x128xf32>
    %83 = vector.extract_strided_slice %81 {offsets = [0, 128], sizes = [16, 128], strides = [1, 1]} : vector<16x256xf32> to vector<16x128xf32>
    %84 = arith.negf %83 : vector<16x128xf32>
    %85 = math.exp %84 : vector<16x128xf32>
    %cst_31 = arith.constant 1.000000e+00 : f32
    %86 = vector.broadcast %cst_31 : f32 to vector<16x128xf32>
    %87 = arith.addf %86, %85 : vector<16x128xf32>
    %88 = arith.divf %86, %87 : vector<16x128xf32>
    %89 = arith.addf %82, %88 : vector<16x128xf32>
    %cst_32 = arith.constant 0.00999999977 : f32
    %90 = vector.broadcast %cst_32 : f32 to vector<16x128xf32>
    %91 = arith.mulf %90, %89 : vector<16x128xf32>
    %92 = arith.maximumf %89, %91 : vector<16x128xf32>
    %c0_33 = arith.constant 0 : index
    %c640 = arith.constant 640 : index
    %93 = vector.load %arg4[%c0_33, %c640] : memref<16x1280xf32, #tpu.memory_space<vmem>>, vector<16x128xf32>
    tpu.vector_store %arg4[%c0_33, %c640], %92 {strides = array<i32>} : memref<16x1280xf32, #tpu.memory_space<vmem>>, vector<16x128xf32>,
    %c0_34 = arith.constant 0 : index
    %c24 = arith.constant 24 : index
    %94 = vector.load %arg1[%c0_34, %c24] : memref<16x48xf32, #tpu.memory_space<vmem>>, vector<16x12xf32>
    %cst_35 = arith.constant dense<0.000000e+00> : vector<16x256xf32>
    %95 = tpu.matmul %94, %0, %cst_35 {dimension_numbers = #tpu.dot_dimension_numbers<[1], [0], [0], [1], [0, 0, 1, 1], [], []>} : vector<16x12xf32>, vector<12x256xf32>, vector<16x256xf32> -> vector<16x256xf32>
    %96 = arith.addf %95, %3 : vector<16x256xf32>
    %97 = vector.extract_strided_slice %96 {offsets = [0, 0], sizes = [16, 128], strides = [1, 1]} : vector<16x256xf32> to vector<16x128xf32>
    %98 = vector.extract_strided_slice %96 {offsets = [0, 128], sizes = [16, 128], strides = [1, 1]} : vector<16x256xf32> to vector<16x128xf32>
    %99 = arith.negf %98 : vector<16x128xf32>
    %100 = math.exp %99 : vector<16x128xf32>
    %cst_36 = arith.constant 1.000000e+00 : f32
    %101 = vector.broadcast %cst_36 : f32 to vector<16x128xf32>
    %102 = arith.addf %101, %100 : vector<16x128xf32>
    %103 = arith.divf %101, %102 : vector<16x128xf32>
    %104 = arith.addf %97, %103 : vector<16x128xf32>
    %cst_37 = arith.constant 0.00999999977 : f32
    %105 = vector.broadcast %cst_37 : f32 to vector<16x128xf32>
    %106 = arith.mulf %105, %104 : vector<16x128xf32>
    %107 = arith.maximumf %104, %106 : vector<16x128xf32>
    %c0_38 = arith.constant 0 : index
    %c768 = arith.constant 768 : index
    %108 = vector.load %arg4[%c0_38, %c768] : memref<16x1280xf32, #tpu.memory_space<vmem>>, vector<16x128xf32>
    tpu.vector_store %arg4[%c0_38, %c768], %107 {strides = array<i32>} : memref<16x1280xf32, #tpu.memory_space<vmem>>, vector<16x128xf32>,
    %c0_39 = arith.constant 0 : index
    %c28 = arith.constant 28 : index
    %109 = vector.load %arg1[%c0_39, %c28] : memref<16x48xf32, #tpu.memory_space<vmem>>, vector<16x12xf32>
    %cst_40 = arith.constant dense<0.000000e+00> : vector<16x256xf32>
    %110 = tpu.matmul %109, %0, %cst_40 {dimension_numbers = #tpu.dot_dimension_numbers<[1], [0], [0], [1], [0, 0, 1, 1], [], []>} : vector<16x12xf32>, vector<12x256xf32>, vector<16x256xf32> -> vector<16x256xf32>
    %111 = arith.addf %110, %3 : vector<16x256xf32>
    %112 = vector.extract_strided_slice %111 {offsets = [0, 0], sizes = [16, 128], strides = [1, 1]} : vector<16x256xf32> to vector<16x128xf32>
    %113 = vector.extract_strided_slice %111 {offsets = [0, 128], sizes = [16, 128], strides = [1, 1]} : vector<16x256xf32> to vector<16x128xf32>
    %114 = arith.negf %113 : vector<16x128xf32>
    %115 = math.exp %114 : vector<16x128xf32>
    %cst_41 = arith.constant 1.000000e+00 : f32
    %116 = vector.broadcast %cst_41 : f32 to vector<16x128xf32>
    %117 = arith.addf %116, %115 : vector<16x128xf32>
    %118 = arith.divf %116, %117 : vector<16x128xf32>
    %119 = arith.addf %112, %118 : vector<16x128xf32>
    %cst_42 = arith.constant 0.00999999977 : f32
    %120 = vector.broadcast %cst_42 : f32 to vector<16x128xf32>
    %121 = arith.mulf %120, %119 : vector<16x128xf32>
    %122 = arith.maximumf %119, %121 : vector<16x128xf32>
    %c0_43 = arith.constant 0 : index
    %c896 = arith.constant 896 : index
    %123 = vector.load %arg4[%c0_43, %c896] : memref<16x1280xf32, #tpu.memory_space<vmem>>, vector<16x128xf32>
    tpu.vector_store %arg4[%c0_43, %c896], %122 {strides = array<i32>} : memref<16x1280xf32, #tpu.memory_space<vmem>>, vector<16x128xf32>,
    %c0_44 = arith.constant 0 : index
    %c32 = arith.constant 32 : index
    %124 = vector.load %arg1[%c0_44, %c32] : memref<16x48xf32, #tpu.memory_space<vmem>>, vector<16x12xf32>
    %cst_45 = arith.constant dense<0.000000e+00> : vector<16x256xf32>
    %125 = tpu.matmul %124, %0, %cst_45 {dimension_numbers = #tpu.dot_dimension_numbers<[1], [0], [0], [1], [0, 0, 1, 1], [], []>} : vector<16x12xf32>, vector<12x256xf32>, vector<16x256xf32> -> vector<16x256xf32>
    %126 = arith.addf %125, %3 : vector<16x256xf32>
    %127 = vector.extract_strided_slice %126 {offsets = [0, 0], sizes = [16, 128], strides = [1, 1]} : vector<16x256xf32> to vector<16x128xf32>
    %128 = vector.extract_strided_slice %126 {offsets = [0, 128], sizes = [16, 128], strides = [1, 1]} : vector<16x256xf32> to vector<16x128xf32>
    %129 = arith.negf %128 : vector<16x128xf32>
    %130 = math.exp %129 : vector<16x128xf32>
    %cst_46 = arith.constant 1.000000e+00 : f32
    %131 = vector.broadcast %cst_46 : f32 to vector<16x128xf32>
    %132 = arith.addf %131, %130 : vector<16x128xf32>
    %133 = arith.divf %131, %132 : vector<16x128xf32>
    %134 = arith.addf %127, %133 : vector<16x128xf32>
    %cst_47 = arith.constant 0.00999999977 : f32
    %135 = vector.broadcast %cst_47 : f32 to vector<16x128xf32>
    %136 = arith.mulf %135, %134 : vector<16x128xf32>
    %137 = arith.maximumf %134, %136 : vector<16x128xf32>
    %c0_48 = arith.constant 0 : index
    %c1024 = arith.constant 1024 : index
    %138 = vector.load %arg4[%c0_48, %c1024] : memref<16x1280xf32, #tpu.memory_space<vmem>>, vector<16x128xf32>
    tpu.vector_store %arg4[%c0_48, %c1024], %137 {strides = array<i32>} : memref<16x1280xf32, #tpu.memory_space<vmem>>, vector<16x128xf32>,
    %c0_49 = arith.constant 0 : index
    %c36 = arith.constant 36 : index
    %139 = vector.load %arg1[%c0_49, %c36] : memref<16x48xf32, #tpu.memory_space<vmem>>, vector<16x12xf32>
    %cst_50 = arith.constant dense<0.000000e+00> : vector<16x256xf32>
    %140 = tpu.matmul %139, %0, %cst_50 {dimension_numbers = #tpu.dot_dimension_numbers<[1], [0], [0], [1], [0, 0, 1, 1], [], []>} : vector<16x12xf32>, vector<12x256xf32>, vector<16x256xf32> -> vector<16x256xf32>
    %141 = arith.addf %140, %3 : vector<16x256xf32>
    %142 = vector.extract_strided_slice %141 {offsets = [0, 0], sizes = [16, 128], strides = [1, 1]} : vector<16x256xf32> to vector<16x128xf32>
    %143 = vector.extract_strided_slice %141 {offsets = [0, 128], sizes = [16, 128], strides = [1, 1]} : vector<16x256xf32> to vector<16x128xf32>
    %144 = arith.negf %143 : vector<16x128xf32>
    %145 = math.exp %144 : vector<16x128xf32>
    %cst_51 = arith.constant 1.000000e+00 : f32
    %146 = vector.broadcast %cst_51 : f32 to vector<16x128xf32>
    %147 = arith.addf %146, %145 : vector<16x128xf32>
    %148 = arith.divf %146, %147 : vector<16x128xf32>
    %149 = arith.addf %142, %148 : vector<16x128xf32>
    %cst_52 = arith.constant 0.00999999977 : f32
    %150 = vector.broadcast %cst_52 : f32 to vector<16x128xf32>
    %151 = arith.mulf %150, %149 : vector<16x128xf32>
    %152 = arith.maximumf %149, %151 : vector<16x128xf32>
    %c0_53 = arith.constant 0 : index
    %c1152 = arith.constant 1152 : index
    %153 = vector.load %arg4[%c0_53, %c1152] : memref<16x1280xf32, #tpu.memory_space<vmem>>, vector<16x128xf32>
    tpu.vector_store %arg4[%c0_53, %c1152], %152 {strides = array<i32>} : memref<16x1280xf32, #tpu.memory_space<vmem>>, vector<16x128xf32>,
    return
  }
  func.func @transform_0(%arg0: i32) -> (i32, i32) {
    %c0_i32 = arith.constant 0 : i32
    %c0_i32_0 = arith.constant 0 : i32
    return %arg0, %c0_i32 : i32, i32
  }
  func.func @transform_1(%arg0: i32) -> (i32, i32) {
    %c0_i32 = arith.constant 0 : i32
    %c0_i32_0 = arith.constant 0 : i32
    %c0_i32_1 = arith.constant 0 : i32
    return %c0_i32, %c0_i32_0 : i32, i32
  }
  func.func @transform_2(%arg0: i32) -> (i32, i32) {
    %c0_i32 = arith.constant 0 : i32
    %c0_i32_0 = arith.constant 0 : i32
    %c0_i32_1 = arith.constant 0 : i32
    return %c0_i32, %c0_i32_0 : i32, i32
  }
  func.func @transform_3(%arg0: i32) -> (i32, i32) {
    %c0_i32 = arith.constant 0 : i32
    %c0_i32_0 = arith.constant 0 : i32
    return %arg0, %c0_i32 : i32, i32
  }
}

</mosaic_0001>

<bundles_post_ra>
// kernel: _timeblock_call.1
= control target key start
LH: loop header
LB: loop body
LE: loop exit
PB: predicated region body
PF: predicated region fallthrough
CT: control target
= control target key end

     0   :  { %s1757_s0 = inlined_call_operand.vmem [shape: f32[16,48], index: 0, kind: input, shape index: {}]   ;;  %s1758_s1 = inlined_call_operand.vmem [shape: f32[12,256], index: 1, kind: input, shape index: {}]   ;;  %s1759_s2 = inlined_call_operand.vmem [shape: f32[1,256], index: 2, kind: input, shape index: {}]   ;;  %s1760_s3 = inlined_call_operand.hbm [shape: f32[16,1280], index: 3, kind: output, shape index: {}]  }
   0x1   :  { %v341_v0 = vld [vmem:[%s1757_s0] sm:$0xff] }
   0x2   :  { %8 = vsyncpa [#allocation3], 0  ;;  %s1285_s14 = smov 116   ;;  %s1286_s15 = smov 124   ;;  %v134_v1 = vld [vmem:[%s1757_s0 + $0x8] sm:$0xff]  ;;  %vm34_vm0 = vcmask 1043456  }
   0x3   :  { %345 = vrot.lane.b32.xlu1 %v341_v0, %s1285_s14  ;;  %137 = vrot.lane.b32.xlu0 %v341_v0, %s1286_s15  ;;  %s1287_s18 = smov 120   ;;  %v1326_v2 = vld [vmem:[%s1758_s1 + $0x18] sm:$0xf]  ;;  %v1331_v3 = vld [vmem:[%s1758_s1 + $0x8] sm:$0xff]  ;;  %vm27_vm1 = vcmask 97280   ;;  %s1288_s24 = smov 112  }
   0x4   :  { %347 = vrot.lane.b32.xlu2 %v134_v1, %s1285_s14  ;;  %1090 = vmatpush.msk.msra.mxu1 %vm34_vm0, %v1326_v2  ;;  %v1338_v4 = vld [vmem:[%s1758_s1 + $0x10] sm:$0xf]  ;;  %s1289_s25 = smov 108   ;;  %s1290_s26 = smov 100   ;;  %v15_v5 = vld [vmem:[%s1758_s1] sm:$0xff] }
   0x5   :  { %1098 = vmatpush.msk.msra.mxu3 %vm34_vm0, %v1326_v2  ;;  %1095 = vmatpush.msk.msra.mxu2 %vm34_vm0, %v1338_v4  ;;  %s1291_s27 = smov 104   ;;  %s1292_s28 = smov 92   ;;  %v19_v18 = vld [vmem:[%s1759_s2] sm:$0x3] }
   0x6   :  { %1087 = vmatpush.msk.msra.mxu0 %vm34_vm0, %v1338_v4  ;;  %79 = vmatpush.msra.mxu1 %v1331_v3  ;;  %s1293_s29 = smov 96   ;;  %v1420_v19 = vperm.slane %v19_v18, 1  ;;  %v1438_v43 = vperm.slane %v19_v18, 0  ;;  %s1294_s2 = smov [#allocation2]  }
   0x7   :  { %183 = vmatpush.msra.mxu3 %v1331_v3  ;;  %1091 = vmatmul.msk.f32.vlgmr.msra.gmra.mxu1 %vm27_vm1, %v341_v0  ;;  %s1073_s6 = sshll.u32 %s1294_s2, 4  ;;  %s1075_s9 = sshll.u32 %s1760_s3, 4  ;;  %s1074_s6 = int_to_ptr.vmem [resolvable:$true] %s1073_s6  ;;  %s1076_s9 = int_to_ptr.hbm [resolvable:$true] %s1075_s9 }
   0x8   :  { %1106 = vmatpush.msk.msrb.mxu1 %vm34_vm0, %v1326_v2  ;;  %160 = vmatpush.msra.mxu2 %v15_v5  ;;  %s1295_s10 = smov 1280   ;;  %s1296_s11 = smov 80  }
   0x9   :  { %1114 = vmatpush.msk.msrb.mxu3 %vm34_vm0, %v1326_v2  ;;  %56 = vmatpush.msra.mxu0 %v15_v5 }
   0xa   :  { %287 = vmatpush.msrb.mxu1 %v1331_v3  ;;  %1088 = vmatmul.msk.f32.vlgmr.msra.gmra.mxu0 %vm27_vm1, %v341_v0 }
   0xb   :  { %241 = vrot.lane.b32.xlu1 %v341_v0, %s1287_s18  ;;  %139 = vrot.lane.b32.xlu0 %v134_v1, %s1286_s15 }
   0xc   :  { %243 = vrot.lane.b32.xlu2 %v134_v1, %s1287_s18  ;;  %391 = vmatpush.msrb.mxu3 %v1331_v3 }
   0xd   :  { %1122 = vmatpush.msk.msra.mxu1 %vm34_vm0, %v1326_v2  ;;  %1111 = vmatpush.msk.msrb.mxu2 %vm34_vm0, %v1338_v4 }
   0xe   :  { %1103 = vmatpush.msk.msrb.mxu0 %vm34_vm0, %v1338_v4 }
   0xf   :  { %495 = vmatpush.msra.mxu1 %v1331_v3  ;;  %368 = vmatpush.msrb.mxu2 %v15_v5 }
  0x10   :  { %1092 = vmatmul.msk.f32.gmra.mxu1 %vm27_vm1, %v134_v1  ;;  %264 = vmatpush.msrb.mxu0 %v15_v5 }
  0x12   :  { %1119 = vmatpush.msk.msra.mxu0 %vm34_vm0, %v1338_v4 }
  0x13   :  { %449 = vrot.lane.b32.xlu1 %v341_v0, %s1288_s24  ;;  %553 = vrot.lane.b32.xlu0 %v341_v0, %s1289_s25 }
  0x14   :  { %555 = vrot.lane.b32.xlu2 %v134_v1, %s1289_s25  ;;  %472 = vmatpush.msra.mxu0 %v15_v5 }
  0x15   :  { %1089 = vmatmul.msk.f32.gmra.mxu0 %vm27_vm1, %v134_v1 }
  0x1b   :  { %451 = vrot.lane.b32.xlu0 %v134_v1, %s1288_s24  ;;  %761 = vrot.lane.b32.xlu1 %v341_v0, %s1290_s26 }
  0x1c   :  { %657 = vrot.lane.b32.xlu2 %v341_v0, %s1291_s27 }
  0x23   :  { %659 = vrot.lane.b32.xlu1 %v134_v1, %s1291_s27  ;;  %763 = vrot.lane.b32.xlu0 %v134_v1, %s1290_s26 }
  0x24   :  { %969 = vrot.lane.b32.xlu2 %v341_v0, %s1292_s28 }
  0x2b   :  { %865 = vrot.lane.b32.xlu0 %v341_v0, %s1293_s29  ;;  %971 = vrot.lane.b32.xlu1 %v134_v1, %s1292_s28 }
  0x2c   :  { %867 = vrot.lane.b32.xlu2 %v134_v1, %s1293_s29 }
  0x5e   :  { %v348_v8 = vpop.permute.xlu2 %347 }
  0x66   :  { %v244_v11 = vpop.permute.xlu2 %243 }
  0x6e   :  { %v556_v14 = vpop.permute.xlu2 %555 }
  0x75   :  { %v346_v6 = vpop.permute.xlu1 %345  ;;  %v138_v7 = vpop.permute.xlu0 %137 }
  0x76   :  { %1096 = vmatmul.msk.f32.vlgmr.msra.gmra.mxu2 %vm27_vm1, %v138_v7  ;;  %1099 = vmatmul.msk.f32.vlgmr.msra.gmra.mxu3 %vm27_vm1, %v138_v7  ;;  %v658_v17 = vpop.permute.xlu2 %657 }
  0x77   :  { %1130 = vmatpush.msk.msra.mxu3 %vm34_vm0, %v1326_v2  ;;  %1127 = vmatpush.msk.msra.mxu2 %vm34_vm0, %v1338_v4 }
  0x79   :  { %599 = vmatpush.msra.mxu3 %v1331_v3  ;;  %576 = vmatpush.msra.mxu2 %v15_v5 }
  0x7d   :  { %v242_v9 = vpop.permute.xlu1 %241  ;;  %v140_v10 = vpop.permute.xlu0 %139 }
  0x7e   :  { %1097 = vmatmul.msk.f32.gmra.mxu2 %vm27_vm1, %v140_v10  ;;  %1100 = vmatmul.msk.f32.gmra.mxu3 %vm27_vm1, %v140_v10  ;;  %v970_v25 = vpop.permute.xlu2 %969 }
  0x7f   :  { %1107 = vmatmul.msk.f32.vlgmr.msrb.gmra.mxu1 %vm27_vm1, %v242_v9  ;;  %1104 = vmatmul.msk.f32.vlgmr.msrb.gmra.mxu0 %vm27_vm1, %v242_v9 }
  0x80   :  { %1138 = vmatpush.msk.msrb.mxu1 %vm34_vm0, %v1326_v2  ;;  %1135 = vmatpush.msk.msrb.mxu0 %vm34_vm0, %v1338_v4 }
  0x82   :  { %703 = vmatpush.msrb.mxu1 %v1331_v3  ;;  %680 = vmatpush.msrb.mxu0 %v15_v5 }
  0x84   :  { %v81_v20 = vpop.f32.mrf.mxu1 }
  0x85   :  { %v554_v12 = vpop.permute.xlu0 %553  ;;  %v450_v13 = vpop.permute.xlu1 %449  ;;  %v82_v22 = vadd.f32 %v81_v20, %v1420_v19 }
  0x86   :  { %1112 = vmatmul.msk.f32.vlgmr.msrb.gmra.mxu2 %vm27_vm1, %v346_v6  ;;  %1115 = vmatmul.msk.f32.vlgmr.msrb.gmra.mxu3 %vm27_vm1, %v346_v6  ;;  %v868_v29 = vpop.permute.xlu2 %867 }
  0x87   :  { %1108 = vmatmul.msk.f32.gmra.mxu1 %vm27_vm1, %v244_v11  ;;  %1105 = vmatmul.msk.f32.gmra.mxu0 %vm27_vm1, %v244_v11  ;;  %v1093_v24 = vmul.f32 -1.442695, %v82_v22  ;;  %v58_v44 = vpop.f32.mrf.mxu0 }
  0x88   :  { %1146 = vmatpush.msk.msrb.mxu3 %vm34_vm0, %v1326_v2  ;;  %1143 = vmatpush.msk.msrb.mxu2 %vm34_vm0, %v1338_v4  ;;  %v59_v46 = vadd.f32 %v58_v44, %v1438_v43 }
  0x89   :  { %1179 = vpow2.f32 %v1093_v24 }
  0x8a   :  { %807 = vmatpush.msrb.mxu3 %v1331_v3  ;;  %784 = vmatpush.msrb.mxu2 %v15_v5 }
  0x8d   :  { %v452_v15 = vpop.permute.xlu0 %451  ;;  %v762_v16 = vpop.permute.xlu1 %761 }
  0x8e   :  { %1113 = vmatmul.msk.f32.gmra.mxu2 %vm27_vm1, %v348_v8  ;;  %1116 = vmatmul.msk.f32.gmra.mxu3 %vm27_vm1, %v348_v8  ;;  %v84_v34 = vpop.f32.mrf.mxu1 }
  0x8f   :  { %1123 = vmatmul.msk.f32.vlgmr.msra.gmra.mxu1 %vm27_vm1, %v450_v13  ;;  %1120 = vmatmul.msk.f32.vlgmr.msra.gmra.mxu0 %vm27_vm1, %v450_v13  ;;  %v1180_v27 = vpop.eup %1179  ;;  %v85_v36 = vadd.f32 %v84_v34, %v1420_v19 }
  0x90   :  { %1154 = vmatpush.msk.msra.mxu1 %vm34_vm0, %v1326_v2  ;;  %1151 = vmatpush.msk.msra.mxu0 %vm34_vm0, %v1338_v4  ;;  %v93_v28 = vadd.f32 1.0, %v1180_v27 }
  0x91   :  { %v1094_v40 = vmul.f32 -1.442695, %v85_v36 }
  0x92   :  { %911 = vmatpush.msra.mxu1 %v1331_v3  ;;  %888 = vmatpush.msra.mxu0 %v15_v5  ;;  %1181 = vrcp.f32 %v93_v28  ;;  %vm100_vm2 = vweird.f32 %v93_v28  ;;  %v106_v37 = vand.u32 2147483648, %v93_v28  ;;  %v104_v39 = vand.u32 2147483647, %v93_v28  ;;  %v61_v59 = vpop.f32.mrf.mxu0 }
  0x93   :  { %1183 = vpow2.f32 %v1094_v40  ;;  %v62_v61 = vadd.f32 %v61_v59, %v1438_v43 }
  0x94   :  { %v107_v41 = vor.u32 1.1754944e-38, %v106_v37  ;;  %vm105_vm5 = vcmp.eq.f32.partialorder %v104_v39, 8.507059e+37 }
  0x95   :  { %v764_v21 = vpop.permute.xlu0 %763  ;;  %v660_v23 = vpop.permute.xlu1 %659 }
  0x96   :  { %1128 = vmatmul.msk.f32.vlgmr.msra.gmra.mxu2 %vm27_vm1, %v554_v12  ;;  %1131 = vmatmul.msk.f32.vlgmr.msra.gmra.mxu3 %vm27_vm1, %v554_v12 }
  0x97   :  { %1124 = vmatmul.msk.f32.gmra.mxu1 %vm27_vm1, %v452_v15  ;;  %1121 = vmatmul.msk.f32.gmra.mxu0 %vm27_vm1, %v452_v15 }
  0x98   :  { %1162 = vmatpush.msk.msra.mxu3 %vm34_vm0, %v1326_v2  ;;  %1159 = vmatpush.msk.msra.mxu2 %vm34_vm0, %v1338_v4  ;;  %v1182_v31 = vpop.eup %1181 }
  0x99   :  { %v96_v32 = vmul.f32 %v1182_v31, %v93_v28  ;;  %vm101_vm3 = vweird.f32 %v1182_v31  ;;  %v1184_v48 = vpop.eup %1183 }
  0x9a   :  { %1015 = vmatpush.msra.mxu3 %v1331_v3  ;;  %992 = vmatpush.msra.mxu2 %v15_v5  ;;  %vm102_vm4 = vmor %vm100_vm2, %vm101_vm3  ;;  %v94_v51 = vadd.f32 1.0, %v1184_v48 }
  0x9b   :  { %v97_v33 = vsub.f32 1.0, %v96_v32 }
  0x9c   :  { %1185 = vrcp.f32 %v94_v51  ;;  %v121_v56 = vand.u32 2147483648, %v94_v51  ;;  %vm115_vm6 = vweird.f32 %v94_v51  ;;  %v119_v58 = vand.u32 2147483647, %v94_v51 }
  0x9d   :  { %v866_v26 = vpop.permute.xlu0 %865  ;;  %v972_v30 = vpop.permute.xlu1 %971  ;;  %v98_v35 = vmul.f32 %v1182_v31, %v97_v33 }
  0x9e   :  { %1129 = vmatmul.msk.f32.gmra.mxu2 %vm27_vm1, %v556_v14  ;;  %1132 = vmatmul.msk.f32.gmra.mxu3 %vm27_vm1, %v556_v14  ;;  %v122_v60 = vor.u32 1.1754944e-38, %v121_v56  ;;  %vm120_vm9 = vcmp.eq.f32.partialorder %v119_v58, 8.507059e+37 }
  0x9f   :  { %1139 = vmatmul.msk.f32.vlgmr.msrb.gmra.mxu1 %vm27_vm1, %v658_v17  ;;  %1136 = vmatmul.msk.f32.vlgmr.msrb.gmra.mxu0 %vm27_vm1, %v658_v17  ;;  %v99_v38 = vadd.f32 %v1182_v31, %v98_v35 }
  0xa1   :  { %v103_v42 = vsel %vm102_vm4, %v1182_v31, %v99_v38 }
  0xa2   :  { %v108_v45 = vsel %vm105_vm5, %v107_v41, %v103_v42  ;;  %v1186_v52 = vpop.eup %1185 }
  0xa3   :  { %v125_v47 = vadd.f32 %v108_v45, %v59_v46  ;;  %v111_v53 = vmul.f32 %v1186_v52, %v94_v51  ;;  %vm116_vm7 = vweird.f32 %v1186_v52 }
  0xa4   :  { %vm117_vm8 = vmor %vm115_vm6, %vm116_vm7 }
  0xa5   :  { %v127_v49 = vmul.f32 0.01, %v125_v47  ;;  %v112_v54 = vsub.f32 1.0, %v111_v53 }
  0xa6   :  { %1144 = vmatmul.msk.f32.vlgmr.msrb.gmra.mxu2 %vm27_vm1, %v762_v16  ;;  %1147 = vmatmul.msk.f32.vlgmr.msrb.gmra.mxu3 %vm27_vm1, %v762_v16 }
  0xa7   :  { %1140 = vmatmul.msk.f32.gmra.mxu1 %vm27_vm1, %v660_v23  ;;  %1137 = vmatmul.msk.f32.gmra.mxu0 %vm27_vm1, %v660_v23  ;;  %v129_v50 = vmax.f32 %v125_v47, %v127_v49  ;;  %v113_v55 = vmul.f32 %v1186_v52, %v112_v54 }
  0xa9   :  { %131 = vst [vmem:[#allocation2] sm:$0xff] %v129_v50  ;;  %v114_v57 = vadd.f32 %v1186_v52, %v113_v55 }
  0xab   :  { %v118_v62 = vsel %vm117_vm8, %v1186_v52, %v114_v57 }
  0xac   :  { %v123_v63 = vsel %vm120_vm9, %v122_v60, %v118_v62 }
  0xad   :  { %v126_v0 = vadd.f32 %v123_v63, %v62_v61 }
  0xae   :  { %1145 = vmatmul.msk.f32.gmra.mxu2 %vm27_vm1, %v764_v21  ;;  %1148 = vmatmul.msk.f32.gmra.mxu3 %vm27_vm1, %v764_v21 }
  0xaf   :  { %1155 = vmatmul.msk.f32.vlgmr.msra.gmra.mxu1 %vm27_vm1, %v866_v26  ;;  %1152 = vmatmul.msk.f32.vlgmr.msra.gmra.mxu0 %vm27_vm1, %v866_v26  ;;  %v128_v1 = vmul.f32 0.01, %v126_v0 }
  0xb1   :  { %v130_v2 = vmax.f32 %v126_v0, %v128_v1 }
  0xb3   :  { %132 = vst [vmem:[#allocation2 + $0x50] sm:$0xff] %v130_v2 }
  0xb6   :  { %1160 = vmatmul.msk.f32.vlgmr.msra.gmra.mxu2 %vm27_vm1, %v970_v25  ;;  %1163 = vmatmul.msk.f32.vlgmr.msra.gmra.mxu3 %vm27_vm1, %v970_v25 }
  0xb7   :  { %1156 = vmatmul.msk.f32.gmra.mxu1 %vm27_vm1, %v868_v29  ;;  %1153 = vmatmul.msk.f32.gmra.mxu0 %vm27_vm1, %v868_v29 }
  0xbe   :  { %1161 = vmatmul.msk.f32.gmra.mxu2 %vm27_vm1, %v972_v30  ;;  %1164 = vmatmul.msk.f32.gmra.mxu3 %vm27_vm1, %v972_v30 }
  0xf9   :  { %v162_v3 = vpop.f32.mrf.mxu2  ;;  %v185_v4 = vpop.f32.mrf.mxu3 }
  0xfa   :  { %v186_v5 = vadd.f32 %v185_v4, %v1420_v19  ;;  %v163_v32 = vadd.f32 %v162_v3, %v1438_v43 }
  0xfc   :  { %v1101_v6 = vmul.f32 -1.442695, %v186_v5  ;;  %v289_v7 = vpop.f32.mrf.mxu1  ;;  %v266_v9 = vpop.f32.mrf.mxu0 }
  0xfd   :  { %v290_v8 = vadd.f32 %v289_v7, %v1420_v19  ;;  %v267_v38 = vadd.f32 %v266_v9, %v1438_v43 }
  0xfe   :  { %1187 = vpow2.f32 %v1101_v6 }
  0xff   :  { %v1109_v10 = vmul.f32 -1.442695, %v290_v8 }
 0x101   :  { %1189 = vpow2.f32 %v1109_v10  ;;  %v188_v11 = vpop.f32.mrf.mxu3  ;;  %v165_v12 = vpop.f32.mrf.mxu2 }
 0x102   :  { %v189_v13 = vadd.f32 %v188_v11, %v1420_v19  ;;  %v1452_v37 = vadd.f32 %v165_v12, %v1438_v43 }
 0x104   :  { %v1188_v14 = vpop.eup %1187  ;;  %v1102_v15 = vmul.f32 -1.442695, %v189_v13  ;;  %v292_v16 = vpop.f32.mrf.mxu1 }
 0x105   :  { %v197_v17 = vadd.f32 1.0, %v1188_v14  ;;  %v293_v18 = vadd.f32 %v292_v16, %v1420_v19  ;;  %v269_v23 = vpop.f32.mrf.mxu0 }
 0x106   :  { %1191 = vpow2.f32 %v1102_v15  ;;  %v1456_v39 = vadd.f32 %v269_v23, %v1438_v43 }
 0x107   :  { %v1190_v20 = vpop.eup %1189  ;;  %1193 = vrcp.f32 %v197_v17  ;;  %v1110_v22 = vmul.f32 -1.442695, %v293_v18  ;;  %v208_v25 = vand.u32 2147483647, %v197_v17  ;;  %v210_v26 = vand.u32 2147483648, %v197_v17 }
 0x108   :  { %v301_v21 = vadd.f32 1.0, %v1190_v20  ;;  %vm204_vm10 = vweird.f32 %v197_v17 }
 0x109   :  { %v393_v24 = vpop.f32.mrf.mxu3  ;;  %v370_v29 = vpop.f32.mrf.mxu2  ;;  %vm1458_vm11 = vcmp.eq.f32.partialorder %v208_v25, 8.507059e+37  ;;  %v211_v41 = vor.u32 1.1754944e-38, %v210_v26 }
 0x10a   :  { %1195 = vrcp.f32 %v301_v21  ;;  %v394_v27 = vadd.f32 %v393_v24, %v1420_v19  ;;  %v312_v45 = vand.u32 2147483647, %v301_v21  ;;  %vm308_vm12 = vweird.f32 %v301_v21 }
 0x10b   :  { %1197 = vpow2.f32 %v1110_v22  ;;  %v314_v49 = vand.u32 2147483648, %v301_v21  ;;  %v1464_v50 = vadd.f32 %v370_v29, %v1438_v43 }
 0x10c   :  { %v1192_v28 = vpop.eup %1191  ;;  %v497_v30 = vpop.f32.mrf.mxu1  ;;  %v1117_v34 = vmul.f32 -1.442695, %v394_v27  ;;  %vm1472_vm15 = vcmp.eq.f32.partialorder %v312_v45, 8.507059e+37 }
 0x10d   :  { %v1194_v31 = vpop.eup %1193  ;;  %v1448_v33 = vadd.f32 1.0, %v1192_v28  ;;  %v498_v35 = vadd.f32 %v497_v30, %v1420_v19  ;;  %v474_v54 = vpop.f32.mrf.mxu0  ;;  %v315_v0 = vor.u32 1.1754944e-38, %v314_v49 }
 0x10e   :  { %v200_v36 = vmul.f32 %v1194_v31, %v197_v17  ;;  %vm205_vm13 = vweird.f32 %v1194_v31  ;;  %v1478_v2 = vadd.f32 %v474_v54, %v1438_v43 }
 0x10f   :  { %1199 = vrcp.f32 %v1448_v33  ;;  %v1125_v46 = vmul.f32 -1.442695, %v498_v35  ;;  %v223_v55 = vand.u32 2147483647, %v1448_v33  ;;  %v225_v59 = vand.u32 2147483648, %v1448_v33  ;;  %vm206_vm0 = vmor %vm204_vm10, %vm205_vm13 }
 0x110   :  { %v1196_v42 = vpop.eup %1195  ;;  %v201_v44 = vsub.f32 1.0, %v200_v36  ;;  %1201 = vpow2.f32 %v1117_v34  ;;  %vm219_vm1 = vweird.f32 %v1448_v33 }
 0x111   :  { %v1198_v47 = vpop.eup %1197  ;;  %v304_v48 = vmul.f32 %v1196_v42, %v301_v21  ;;  %v396_v51 = vpop.f32.mrf.mxu3  ;;  %1203 = vpow2.f32 %v1125_v46  ;;  %vm309_vm14 = vweird.f32 %v1196_v42  ;;  %vm1491_vm3 = vcmp.eq.f32.partialorder %v223_v55, 8.507059e+37 }
 0x112   :  { %v202_v52 = vmul.f32 %v1194_v31, %v201_v44  ;;  %v1466_v53 = vadd.f32 1.0, %v1198_v47  ;;  %v397_v57 = vadd.f32 %v396_v51, %v1420_v19  ;;  %vm1484_vm2 = vmor %vm308_vm12, %vm309_vm14  ;;  %v373_v7 = vpop.f32.mrf.mxu2  ;;  %v226_v16 = vor.u32 1.1754944e-38, %v225_v59 }
 0x113   :  { %v305_v56 = vsub.f32 1.0, %v304_v48  ;;  %v1501_v18 = vadd.f32 %v373_v7, %v1438_v43 }
 0x114   :  { %v203_v58 = vadd.f32 %v1194_v31, %v202_v52  ;;  %1205 = vrcp.f32 %v1466_v53  ;;  %v500_v61 = vpop.f32.mrf.mxu1  ;;  %v1118_v1 = vmul.f32 -1.442695, %v397_v57  ;;  %vm323_vm5 = vweird.f32 %v1466_v53 }
 0x115   :  { %v1200_v62 = vpop.eup %1199  ;;  %v306_v63 = vmul.f32 %v1196_v42, %v305_v56  ;;  %v501_v8 = vadd.f32 %v500_v61, %v1420_v19  ;;  %v327_v30 = vand.u32 2147483647, %v1466_v53 }
 0x116   :  { %v1202_v3 = vpop.eup %1201  ;;  %v207_v4 = vsel %vm206_vm0, %v1194_v31, %v203_v58  ;;  %v215_v5 = vmul.f32 %v1200_v62, %v1448_v33  ;;  %1207 = vpow2.f32 %v1118_v1  ;;  %vm220_vm4 = vweird.f32 %v1200_v62 }
 0x117   :  { %v212_v9 = vsel %vm1458_vm11, %v211_v41, %v207_v4  ;;  %v307_v11 = vadd.f32 %v1196_v42, %v306_v63  ;;  %v1495_v12 = vadd.f32 1.0, %v1202_v3  ;;  %v1204_v13 = vpop.eup %1203  ;;  %v1126_v24 = vmul.f32 -1.442695, %v501_v8  ;;  %vm221_vm6 = vmor %vm219_vm1, %vm220_vm4 }
 0x118   :  { %v229_v14 = vadd.f32 %v212_v9, %v163_v32  ;;  %v216_v15 = vsub.f32 1.0, %v215_v5  ;;  %v1505_v26 = vadd.f32 1.0, %v1204_v13  ;;  %v329_v31 = vand.u32 2147483648, %v1466_v53 }
 0x119   :  { %v311_v17 = vsel %vm1484_vm2, %v1196_v42, %v307_v11  ;;  %1209 = vrcp.f32 %v1495_v12  ;;  %v601_v32 = vpop.f32.mrf.mxu3  ;;  %v416_v40 = vand.u32 2147483647, %v1495_v12  ;;  %v418_v41 = vand.u32 2147483648, %v1495_v12 }
 0x11a   :  { %v1206_v20 = vpop.eup %1205  ;;  %v231_v21 = vmul.f32 0.01, %v229_v14  ;;  %v217_v22 = vmul.f32 %v1200_v62, %v216_v15  ;;  %v316_v23 = vsel %vm1472_vm15, %v315_v0, %v311_v17  ;;  %1211 = vrcp.f32 %v1505_v26 }
 0x11b   :  { %v333_v25 = vadd.f32 %v316_v23, %v267_v38  ;;  %v319_v27 = vmul.f32 %v1206_v20, %v1466_v53  ;;  %vm324_vm7 = vweird.f32 %v1206_v20  ;;  %1213 = vpow2.f32 %v1126_v24 }
 0x11c   :  { %v233_v28 = vmax.f32 %v229_v14, %v231_v21  ;;  %v218_v29 = vadd.f32 %v1200_v62, %v217_v22  ;;  %v1208_v36 = vpop.eup %1207  ;;  %v705_v47 = vpop.f32.mrf.mxu1  ;;  %vm1526_vm8 = vmor %vm323_vm5, %vm324_vm7  ;;  %vm1530_vm9 = vcmp.eq.f32.partialorder %v327_v30, 8.507059e+37  ;;  %v330_v54 = vor.u32 1.1754944e-38, %v329_v31 }
 0x11d   :  { %v335_v34 = vmul.f32 0.01, %v333_v25  ;;  %v320_v35 = vsub.f32 1.0, %v319_v27  ;;  %v1519_v46 = vadd.f32 1.0, %v1208_v36  ;;  %vm412_vm10 = vweird.f32 %v1495_v12  ;;  %v578_v30 = vpop.f32.mrf.mxu2 }
 0x11e   :  { %235 = vst [vmem:[#allocation2 + $0x8] sm:$0xff] %v233_v28  ;;  %v222_v38 = vsel %vm221_vm6, %v1200_v62, %v218_v29  ;;  %vm1537_vm11 = vcmp.eq.f32.partialorder %v416_v40, 8.507059e+37  ;;  %v419_v58 = vor.u32 1.1754944e-38, %v418_v41  ;;  %vm516_vm12 = vweird.f32 %v1505_v26 }
 0x11f   :  { %v1210_v42 = vpop.eup %1209  ;;  %v227_v44 = vsel %vm1491_vm3, %v226_v16, %v222_v38  ;;  %v337_v45 = vmax.f32 %v333_v25, %v335_v34  ;;  %v321_v33 = vmul.f32 %v1206_v20, %v320_v35  ;;  %1215 = vrcp.f32 %v1519_v46  ;;  %v477_v34 = vpop.f32.mrf.mxu0 }
 0x120   :  { %v230_v48 = vadd.f32 %v227_v44, %v1452_v37  ;;  %v408_v49 = vmul.f32 %v1210_v42, %v1495_v12  ;;  %v520_v37 = vand.u32 2147483647, %v1505_v26  ;;  %v1212_v59 = vpop.eup %1211  ;;  %v522_v61 = vand.u32 2147483648, %v1505_v26 }
 0x121   :  { %339 = vst [vmem:[#allocation2 + $0x10] sm:$0xff] %v337_v45  ;;  %v322_v55 = vadd.f32 %v1206_v20, %v321_v33  ;;  %v602_v62 = vadd.f32 %v601_v32, %v1420_v19  ;;  %v1214_v63 = vpop.eup %1213  ;;  %vm413_vm13 = vweird.f32 %v1210_v42  ;;  %v512_v6 = vmul.f32 %v1212_v59, %v1505_v26  ;;  %v604_v13 = vpop.f32.mrf.mxu3 }
 0x122   :  { %v232_v56 = vmul.f32 0.01, %v230_v48  ;;  %v409_v57 = vsub.f32 1.0, %v408_v49  ;;  %v1549_v5 = vadd.f32 1.0, %v1214_v63  ;;  %vm1552_vm14 = vcmp.eq.f32.partialorder %v520_v37, 8.507059e+37  ;;  %vm414_vm15 = vmor %vm412_vm10, %vm413_vm13 }
 0x123   :  { %v326_v60 = vsel %vm1526_vm8, %v1206_v20, %v322_v55  ;;  %v431_v9 = vand.u32 2147483647, %v1519_v46  ;;  %v1133_v10 = vmul.f32 -1.442695, %v602_v62  ;;  %v706_v11 = vadd.f32 %v705_v47, %v1420_v19 }
 0x124   :  { %v234_v0 = vmax.f32 %v230_v48, %v232_v56  ;;  %v410_v1 = vmul.f32 %v1210_v42, %v409_v57  ;;  %v331_v3 = vsel %vm1530_vm9, %v330_v54, %v326_v60  ;;  %1217 = vrcp.f32 %v1549_v5  ;;  %v708_v25 = vpop.f32.mrf.mxu1 }
 0x125   :  { %v334_v4 = vadd.f32 %v331_v3, %v1456_v39  ;;  %v1216_v14 = vpop.eup %1215  ;;  %v513_v15 = vsub.f32 1.0, %v512_v6  ;;  %vm517_vm0 = vweird.f32 %v1212_v59  ;;  %v433_v20 = vand.u32 2147483648, %v1519_v46 }
 0x126   :  { %236 = vst [vmem:[#allocation2 + $0x58] sm:$0xff] %v234_v0  ;;  %v411_v8 = vadd.f32 %v1210_v42, %v410_v1  ;;  %v423_v17 = vmul.f32 %v1216_v14, %v1519_v46  ;;  %1219 = vpow2.f32 %v1133_v10  ;;  %v1141_v24 = vmul.f32 -1.442695, %v706_v11  ;;  %vm1569_vm2 = vmor %vm516_vm12, %vm517_vm0 }
 0x127   :  { %v336_v39 = vmul.f32 0.01, %v334_v4  ;;  %v514_v23 = vmul.f32 %v1212_v59, %v513_v15  ;;  %vm427_vm1 = vweird.f32 %v1519_v46  ;;  %v523_v29 = vor.u32 1.1754944e-38, %v522_v61 }
 0x128   :  { %v415_v16 = vsel %vm414_vm15, %v1210_v42, %v411_v8  ;;  %v424_v27 = vsub.f32 1.0, %v423_v17  ;;  %vm1573_vm3 = vcmp.eq.f32.partialorder %v431_v9, 8.507059e+37  ;;  %1221 = vpow2.f32 %v1141_v24  ;;  %v682_v9 = vpop.f32.mrf.mxu0 }
 0x129   :  { %v420_v21 = vsel %vm1537_vm11, %v419_v58, %v415_v16  ;;  %v338_v22 = vmax.f32 %v334_v4, %v336_v39  ;;  %v515_v32 = vadd.f32 %v1212_v59, %v514_v23  ;;  %vm428_vm4 = vweird.f32 %v1216_v14  ;;  %v809_v57 = vpop.f32.mrf.mxu3  ;;  %v581_v4 = vpop.f32.mrf.mxu2 }
 0x12a   :  { %v437_v12 = vadd.f32 %v420_v21, %v1464_v50  ;;  %v605_v50 = vadd.f32 %v604_v13, %v1420_v19  ;;  %v425_v36 = vmul.f32 %v1216_v14, %v424_v27  ;;  %v434_v26 = vor.u32 1.1754944e-38, %v433_v20  ;;  %v1218_v38 = vpop.eup %1217  ;;  %vm429_vm6 = vmor %vm427_vm1, %vm428_vm4 }
 0x12b   :  { %340 = vst [vmem:[#allocation2 + $0x60] sm:$0xff] %v338_v22  ;;  %v519_v40 = vsel %vm1569_vm2, %v1212_v59, %v515_v32  ;;  %vm531_vm5 = vweird.f32 %v1549_v5  ;;  %v709_v42 = vadd.f32 %v708_v25, %v1420_v19  ;;  %v527_v48 = vmul.f32 %v1218_v38, %v1549_v5 }
 0x12c   :  { %v439_v35 = vmul.f32 0.01, %v437_v12  ;;  %v1134_v41 = vmul.f32 -1.442695, %v605_v50  ;;  %v1220_v44 = vpop.eup %1219  ;;  %v426_v33 = vadd.f32 %v1216_v14, %v425_v36  ;;  %v524_v47 = vsel %vm1552_vm14, %v523_v29, %v519_v40  ;;  %v913_v63 = vpop.f32.mrf.mxu1 }
 0x12d   :  { %v541_v49 = vadd.f32 %v524_v47, %v1478_v2  ;;  %v1588_v51 = vadd.f32 1.0, %v1220_v44  ;;  %v535_v52 = vand.u32 2147483647, %v1549_v5  ;;  %v528_v55 = vsub.f32 1.0, %v527_v48 }
 0x12e   :  { %v441_v45 = vmax.f32 %v437_v12, %v439_v35  ;;  %1223 = vpow2.f32 %v1134_v41  ;;  %v430_v54 = vsel %vm429_vm6, %v1216_v14, %v426_v33  ;;  %v537_v37 = vand.u32 2147483648, %v1549_v5  ;;  %v1222_v53 = vpop.eup %1221 }
 0x12f   :  { %v1142_v56 = vmul.f32 -1.442695, %v709_v42  ;;  %v435_v58 = vsel %vm1573_vm3, %v434_v26, %v430_v54  ;;  %v543_v46 = vmul.f32 0.01, %v541_v49  ;;  %1225 = vrcp.f32 %v1588_v51 }
 0x130   :  { %443 = vst [vmem:[#allocation2 + $0x18] sm:$0xff] %v441_v45  ;;  %vm532_vm7 = vweird.f32 %v1218_v38  ;;  %v438_v2 = vadd.f32 %v435_v58, %v1501_v18  ;;  %v1596_v59 = vadd.f32 1.0, %v1222_v53  ;;  %v529_v61 = vmul.f32 %v1218_v38, %v528_v55 }
 0x131   :  { %v545_v60 = vmax.f32 %v541_v49, %v543_v46  ;;  %1227 = vpow2.f32 %v1142_v56  ;;  %v810_v62 = vadd.f32 %v809_v57, %v1420_v19  ;;  %vm1602_vm8 = vmor %vm531_vm5, %vm532_vm7  ;;  %v538_v3 = vor.u32 1.1754944e-38, %v537_v37  ;;  %v812_v35 = vpop.f32.mrf.mxu3  ;;  %v786_v54 = vpop.f32.mrf.mxu2 }
 0x132   :  { %v440_v0 = vmul.f32 0.01, %v438_v2  ;;  %1229 = vrcp.f32 %v1596_v59  ;;  %v624_v6 = vand.u32 2147483647, %v1588_v51  ;;  %v626_v7 = vand.u32 2147483648, %v1588_v51 }
 0x133   :  { %547 = vst [vmem:[#allocation2 + $0x20] sm:$0xff] %v545_v60  ;;  %v530_v8 = vadd.f32 %v1218_v38, %v529_v61  ;;  %vm536_vm9 = vcmp.eq.f32.partialorder %v535_v52, 8.507059e+37  ;;  %v1149_v13 = vmul.f32 -1.442695, %v810_v62  ;;  %v914_v5 = vadd.f32 %v913_v63, %v1420_v19 }
 0x134   :  { %v1224_v18 = vpop.eup %1223  ;;  %v442_v10 = vmax.f32 %v438_v2, %v440_v0  ;;  %v579_v39 = vadd.f32 %v578_v30, %v1438_v43  ;;  %v478_v15 = vadd.f32 %v477_v34, %v1438_v43  ;;  %v1616_v17 = vadd.f32 %v581_v4, %v1438_v43  ;;  %v916_v40 = vpop.f32.mrf.mxu1 }
 0x135   :  { %v1608_v11 = vadd.f32 1.0, %v1224_v18  ;;  %v1226_v14 = vpop.eup %1225  ;;  %v534_v16 = vsel %vm1602_vm8, %v1218_v38, %v530_v8  ;;  %v683_v22 = vadd.f32 %v682_v9, %v1438_v43  ;;  %vm620_vm10 = vweird.f32 %v1588_v51 }
 0x136   :  { %444 = vst [vmem:[#allocation2 + $0x68] sm:$0xff] %v442_v10  ;;  %v616_v20 = vmul.f32 %v1226_v14, %v1588_v51  ;;  %v539_v21 = vsel %vm536_vm9, %v538_v3, %v534_v16  ;;  %vm1622_vm11 = vcmp.eq.f32.partialorder %v624_v6, 8.507059e+37  ;;  %v627_v25 = vor.u32 1.1754944e-38, %v626_v7 }
 0x137   :  { %1231 = vrcp.f32 %v1608_v11  ;;  %v1228_v23 = vpop.eup %1227  ;;  %v542_v12 = vadd.f32 %v539_v21, %v478_v15  ;;  %v1157_v30 = vmul.f32 -1.442695, %v914_v5  ;;  %v728_v34 = vand.u32 2147483647, %v1596_v59 }
 0x138   :  { %v1230_v27 = vpop.eup %1229  ;;  %v617_v28 = vsub.f32 1.0, %v616_v20  ;;  %v1626_v29 = vadd.f32 1.0, %v1228_v23  ;;  %1233 = vpow2.f32 %v1149_v13  ;;  %v730_v50 = vand.u32 2147483648, %v1596_v59 }
 0x139   :  { %v544_v31 = vmul.f32 0.01, %v542_v12  ;;  %v720_v32 = vmul.f32 %v1230_v27, %v1596_v59  ;;  %vm621_vm12 = vweird.f32 %v1226_v14  ;;  %vm724_vm13 = vweird.f32 %v1596_v59  ;;  %v1017_v16 = vpop.f32.mrf.mxu3 }
 0x13a   :  { %v618_v36 = vmul.f32 %v1226_v14, %v617_v28  ;;  %1235 = vrcp.f32 %v1626_v29  ;;  %vm725_vm14 = vweird.f32 %v1230_v27  ;;  %v639_v44 = vand.u32 2147483647, %v1608_v11  ;;  %vm622_vm15 = vmor %vm620_vm10, %vm621_vm12 }
 0x13b   :  { %v546_v26 = vmax.f32 %v542_v12, %v544_v31  ;;  %v721_v38 = vsub.f32 1.0, %v720_v32  ;;  %1237 = vpow2.f32 %v1157_v30  ;;  %v641_v45 = vand.u32 2147483648, %v1608_v11  ;;  %vm1647_vm2 = vmor %vm724_vm13, %vm725_vm14 }
 0x13c   :  { %v619_v42 = vadd.f32 %v1226_v14, %v618_v36  ;;  %v813_v33 = vadd.f32 %v812_v35, %v1420_v19  ;;  %vm1639_vm0 = vcmp.eq.f32.partialorder %v728_v34, 8.507059e+37  ;;  %v731_v52 = vor.u32 1.1754944e-38, %v730_v50 }
 0x13d   :  { %v1232_v41 = vpop.eup %1231  ;;  %548 = vst [vmem:[#allocation2 + $0x70] sm:$0xff] %v546_v26  ;;  %v722_v48 = vmul.f32 %v1230_v27, %v721_v38  ;;  %vm635_vm1 = vweird.f32 %v1608_v11  ;;  %v917_v57 = vadd.f32 %v916_v40, %v1420_v19  ;;  %vm1658_vm3 = vcmp.eq.f32.partialorder %v639_v44, 8.507059e+37 }
 0x13e   :  { %v631_v47 = vmul.f32 %v1232_v41, %v1608_v11  ;;  %v1234_v55 = vpop.eup %1233  ;;  %v623_v37 = vsel %vm622_vm15, %v1226_v14, %v619_v42  ;;  %v1150_v56 = vmul.f32 -1.442695, %v813_v33  ;;  %v642_v59 = vor.u32 1.1754944e-38, %v641_v45 }
 0x13f   :  { %v628_v53 = vsel %vm1622_vm11, %v627_v25, %v623_v37  ;;  %v723_v46 = vadd.f32 %v1230_v27, %v722_v48  ;;  %v1654_v2 = vadd.f32 1.0, %v1234_v55  ;;  %vm636_vm4 = vweird.f32 %v1232_v41 }
 0x140   :  { %v632_v58 = vsub.f32 1.0, %v631_v47  ;;  %v1656_v60 = vpop.eup %1235  ;;  %v645_v61 = vadd.f32 %v628_v53, %v579_v39  ;;  %1239 = vpow2.f32 %v1150_v56  ;;  %vm739_vm5 = vweird.f32 %v1626_v29  ;;  %vm637_vm6 = vmor %vm635_vm1, %vm636_vm4 }
 0x141   :  { %v1238_v63 = vpop.eup %1237  ;;  %v727_v1 = vsel %vm1647_vm2, %v1230_v27, %v723_v46  ;;  %1241 = vrcp.f32 %v1654_v2  ;;  %v1158_v18 = vmul.f32 -1.442695, %v917_v57  ;;  %v735_v9 = vmul.f32 %v1656_v60, %v1626_v29  ;;  %v789_v27 = vpop.f32.mrf.mxu2 }
 0x142   :  { %v633_v0 = vmul.f32 %v1232_v41, %v632_v58  ;;  %v647_v3 = vmul.f32 0.01, %v645_v61  ;;  %v732_v4 = vsel %vm1639_vm0, %v731_v52, %v727_v1  ;;  %v1668_v8 = vadd.f32 1.0, %v1238_v63  ;;  %v1020_v46 = vpop.f32.mrf.mxu3 }
 0x143   :  { %v749_v7 = vadd.f32 %v732_v4, %v683_v22  ;;  %vm740_vm7 = vweird.f32 %v1656_v60  ;;  %v743_v13 = vand.u32 2147483647, %v1626_v29  ;;  %v745_v5 = vand.u32 2147483648, %v1626_v29  ;;  %v685_v22 = vpop.f32.mrf.mxu0 }
 0x144   :  { %v634_v6 = vadd.f32 %v1232_v41, %v633_v0  ;;  %v649_v10 = vmax.f32 %v645_v61, %v647_v3  ;;  %1243 = vrcp.f32 %v1668_v8  ;;  %v736_v15 = vsub.f32 1.0, %v735_v9  ;;  %vm1692_vm8 = vmor %vm739_vm5, %vm740_vm7 }
 0x145   :  { %v751_v39 = vmul.f32 0.01, %v749_v7  ;;  %v832_v11 = vand.u32 2147483647, %v1654_v2  ;;  %1245 = vpow2.f32 %v1158_v18  ;;  %v787_v30 = vadd.f32 %v786_v54, %v1438_v43 }
 0x146   :  { %v638_v14 = vsel %vm637_vm6, %v1232_v41, %v634_v6  ;;  %v1240_v20 = vpop.eup %1239  ;;  %651 = vst [vmem:[#allocation2 + $0x28] sm:$0xff] %v649_v10  ;;  %v737_v12 = vmul.f32 %v1656_v60, %v736_v15  ;;  %v834_v32 = vand.u32 2147483648, %v1654_v2  ;;  %vm744_vm9 = vcmp.eq.f32.partialorder %v743_v13, 8.507059e+37 }
 0x147   :  { %v643_v21 = vsel %vm1658_vm3, %v642_v59, %v638_v14  ;;  %v1242_v23 = vpop.eup %1241  ;;  %v753_v25 = vmax.f32 %v749_v7, %v751_v39  ;;  %v1683_v28 = vadd.f32 1.0, %v1240_v20  ;;  %vm828_vm10 = vweird.f32 %v1654_v2 }
 0x148   :  { %v646_v24 = vadd.f32 %v643_v21, %v1616_v17  ;;  %v824_v31 = vmul.f32 %v1242_v23, %v1654_v2  ;;  %v746_v17 = vor.u32 1.1754944e-38, %v745_v5  ;;  %v738_v35 = vadd.f32 %v1656_v60, %v737_v12 }
 0x149   :  { %755 = vst [vmem:[#allocation2 + $0x30] sm:$0xff] %v753_v25  ;;  %1247 = vrcp.f32 %v1683_v28  ;;  %v686_v26 = vadd.f32 %v685_v22, %v1438_v43  ;;  %v1701_v38 = vadd.f32 %v789_v27, %v1438_v43  ;;  %vm1703_vm11 = vcmp.eq.f32.partialorder %v832_v11, 8.507059e+37 }
 0x14a   :  { %v648_v50 = vmul.f32 0.01, %v646_v24  ;;  %v825_v36 = vsub.f32 1.0, %v824_v31  ;;  %v1244_v29 = vpop.eup %1243  ;;  %v742_v42 = vsel %vm1692_vm8, %v1656_v60, %v738_v35  ;;  %v1018_v44 = vadd.f32 %v1017_v16, %v1420_v19 }
 0x14b   :  { %v1246_v45 = vpop.eup %1245  ;;  %vm829_vm12 = vweird.f32 %v1242_v23  ;;  %v835_v47 = vor.u32 1.1754944e-38, %v834_v32  ;;  %v747_v48 = vsel %vm744_vm9, %v746_v17, %v742_v42  ;;  %v928_v54 = vmul.f32 %v1244_v29, %v1668_v8  ;;  %v890_v59 = vpop.f32.mrf.mxu0 }
 0x14c   :  { %v650_v40 = vmax.f32 %v646_v24, %v648_v50  ;;  %v826_v33 = vmul.f32 %v1242_v23, %v825_v36  ;;  %v750_v49 = vadd.f32 %v747_v48, %v686_v26  ;;  %v1711_v52 = vadd.f32 1.0, %v1246_v45  ;;  %vm830_vm14 = vmor %vm828_vm10, %vm829_vm12  ;;  %v994_v48 = vpop.f32.mrf.mxu2 }
 0x14d   :  { %vm932_vm13 = vweird.f32 %v1668_v8  ;;  %v936_v37 = vand.u32 2147483647, %v1668_v8  ;;  %v938_v51 = vand.u32 2147483648, %v1668_v8  ;;  %v1165_v56 = vmul.f32 -1.442695, %v1018_v44 }
 0x14e   :  { %652 = vst [vmem:[#allocation2 + $0x78] sm:$0xff] %v650_v40  ;;  %v827_v55 = vadd.f32 %v1242_v23, %v826_v33  ;;  %v752_v53 = vmul.f32 0.01, %v750_v49  ;;  %1249 = vrcp.f32 %v1711_v52  ;;  %v929_v58 = vsub.f32 1.0, %v928_v54 }
 0x14f   :  { %v1248_v57 = vpop.eup %1247  ;;  %vm933_vm15 = vweird.f32 %v1244_v29  ;;  %v847_v62 = vand.u32 2147483647, %v1683_v28  ;;  %1251 = vpow2.f32 %v1165_v56  ;;  %v849_v2 = vand.u32 2147483648, %v1683_v28 }
 0x150   :  { %v831_v60 = vsel %vm830_vm14, %v1242_v23, %v827_v55  ;;  %v839_v61 = vmul.f32 %v1248_v57, %v1683_v28  ;;  %v754_v0 = vmax.f32 %v750_v49, %v752_v53  ;;  %v930_v1 = vmul.f32 %v1244_v29, %v929_v58  ;;  %vm1727_vm0 = vmor %vm932_vm13, %vm933_vm15 }
 0x151   :  { %v836_v63 = vsel %vm1703_vm11, %v835_v47, %v831_v60  ;;  %v939_v6 = vor.u32 1.1754944e-38, %v938_v51  ;;  %v1021_v7 = vadd.f32 %v1020_v46, %v1420_v19  ;;  %vm843_vm1 = vweird.f32 %v1683_v28 }
 0x152   :  { %v853_v3 = vadd.f32 %v836_v63, %v787_v30  ;;  %v840_v4 = vsub.f32 1.0, %v839_v61  ;;  %756 = vst [vmem:[#allocation2 + $0x80] sm:$0xff] %v754_v0  ;;  %v891_v9 = vadd.f32 %v890_v59, %v1438_v43  ;;  %v931_v10 = vadd.f32 %v1244_v29, %v930_v1 }
 0x153   :  { %vm937_vm2 = vcmp.eq.f32.partialorder %v936_v37, 8.507059e+37  ;;  %vm844_vm3 = vweird.f32 %v1248_v57  ;;  %v1166_v14 = vmul.f32 -1.442695, %v1021_v7  ;;  %vm1734_vm4 = vcmp.eq.f32.partialorder %v847_v62, 8.507059e+37  ;;  %v893_v50 = vpop.f32.mrf.mxu0 }
 0x154   :  { %v855_v13 = vmul.f32 0.01, %v853_v3  ;;  %v841_v5 = vmul.f32 %v1248_v57, %v840_v4  ;;  %v1250_v39 = vpop.eup %1249  ;;  %v850_v15 = vor.u32 1.1754944e-38, %v849_v2  ;;  %v935_v19 = vsel %vm1727_vm0, %v1244_v29, %v931_v10  ;;  %vm845_vm6 = vmor %vm843_vm1, %vm844_vm3 }
 0x155   :  { %vm947_vm5 = vweird.f32 %v1711_v52  ;;  %v1252_v16 = vpop.eup %1251  ;;  %v940_v11 = vsel %vm937_vm2, %v939_v6, %v935_v19  ;;  %v943_v22 = vmul.f32 %v1250_v39, %v1711_v52  ;;  %v953_v25 = vand.u32 2147483648, %v1711_v52 }
 0x156   :  { %v857_v20 = vmax.f32 %v853_v3, %v855_v13  ;;  %v842_v21 = vadd.f32 %v1248_v57, %v841_v5  ;;  %v957_v23 = vadd.f32 %v940_v11, %v891_v9  ;;  %v1029_v24 = vadd.f32 1.0, %v1252_v16  ;;  %v997_v3 = vpop.f32.mrf.mxu2 }
 0x157   :  { %1253 = vpow2.f32 %v1166_v14  ;;  %v944_v27 = vsub.f32 1.0, %v943_v22  ;;  %vm948_vm7 = vweird.f32 %v1250_v39  ;;  %v951_v30 = vand.u32 2147483647, %v1711_v52 }
 0x158   :  { %859 = vst [vmem:[#allocation2 + $0x38] sm:$0xff] %v857_v20  ;;  %v846_v12 = vsel %vm845_vm6, %v1248_v57, %v842_v21  ;;  %v959_v32 = vmul.f32 0.01, %v957_v23  ;;  %1255 = vrcp.f32 %v1029_v24  ;;  %vm949_vm8 = vmor %vm947_vm5, %vm948_vm7  ;;  %v954_v35 = vor.u32 1.1754944e-38, %v953_v25 }
 0x159   :  { %v851_v31 = vsel %vm1734_vm4, %v850_v15, %v846_v12  ;;  %v945_v28 = vmul.f32 %v1250_v39, %v944_v27  ;;  %vm952_vm9 = vcmp.eq.f32.partialorder %v951_v30, 8.507059e+37  ;;  %v894_v41 = vadd.f32 %v893_v50, %v1438_v43 }
 0x15a   :  { %v854_v34 = vadd.f32 %v851_v31, %v1701_v38  ;;  %v961_v17 = vmax.f32 %v957_v23, %v959_v32  ;;  %v1042_v54 = vand.u32 2147483648, %v1029_v24  ;;  %v1040_v37 = vand.u32 2147483647, %v1029_v24 }
 0x15b   :  { %v946_v26 = vadd.f32 %v1250_v39, %v945_v28  ;;  %vm1036_vm11 = vweird.f32 %v1029_v24  ;;  %v995_v46 = vadd.f32 %v994_v48, %v1438_v43  ;;  %v998_v7 = vadd.f32 %v997_v3, %v1438_v43 }
 0x15c   :  { %v856_v36 = vmul.f32 0.01, %v854_v34  ;;  %963 = vst [vmem:[#allocation2 + $0x40] sm:$0xff] %v961_v17  ;;  %v1043_v53 = vor.u32 1.1754944e-38, %v1042_v54  ;;  %vm1041_vm13 = vcmp.eq.f32.partialorder %v1040_v37, 8.507059e+37 }
 0x15d   :  { %v1254_v29 = vpop.eup %1253  ;;  %v950_v42 = vsel %vm949_vm8, %v1250_v39, %v946_v26 }
 0x15e   :  { %v858_v40 = vmax.f32 %v854_v34, %v856_v36  ;;  %v1030_v44 = vadd.f32 1.0, %v1254_v29  ;;  %v1256_v45 = vpop.eup %1255  ;;  %v955_v33 = vsel %vm952_vm9, %v954_v35, %v950_v42 }
 0x15f   :  { %v1032_v38 = vmul.f32 %v1256_v45, %v1029_v24  ;;  %v958_v47 = vadd.f32 %v955_v33, %v894_v41  ;;  %vm1037_vm10 = vweird.f32 %v1256_v45 }
 0x160   :  { %860 = vst [vmem:[#allocation2 + $0x88] sm:$0xff] %v858_v40  ;;  %1257 = vrcp.f32 %v1030_v44  ;;  %vm1038_vm12 = vmor %vm1036_vm11, %vm1037_vm10  ;;  %v1057_v63 = vand.u32 2147483648, %v1030_v44  ;;  %v1055_v2 = vand.u32 2147483647, %v1030_v44  ;;  %vm1051_vm15 = vweird.f32 %v1030_v44 }
 0x161   :  { %v1033_v49 = vsub.f32 1.0, %v1032_v38  ;;  %v960_v52 = vmul.f32 0.01, %v958_v47 }
 0x162   :  { %v1058_v6 = vor.u32 1.1754944e-38, %v1057_v63  ;;  %vm1056_vm1 = vcmp.eq.f32.partialorder %v1055_v2, 8.507059e+37 }
 0x163   :  { %v1034_v55 = vmul.f32 %v1256_v45, %v1033_v49  ;;  %v962_v51 = vmax.f32 %v958_v47, %v960_v52 }
 0x165   :  { %v1035_v57 = vadd.f32 %v1256_v45, %v1034_v55  ;;  %964 = vst [vmem:[#allocation2 + $0x90] sm:$0xff] %v962_v51 }
 0x166   :  { %v1258_v56 = vpop.eup %1257 }
 0x167   :  { %v1047_v58 = vmul.f32 %v1258_v56, %v1030_v44  ;;  %v1039_v60 = vsel %vm1038_vm12, %v1256_v45, %v1035_v57  ;;  %vm1052_vm14 = vweird.f32 %v1258_v56 }
 0x168   :  { %v1044_v61 = vsel %vm1041_vm13, %v1043_v53, %v1039_v60  ;;  %vm1053_vm0 = vmor %vm1051_vm15, %vm1052_vm14 }
 0x169   :  { %v1048_v62 = vsub.f32 1.0, %v1047_v58  ;;  %v1061_v59 = vadd.f32 %v1044_v61, %v995_v46 }
 0x16b   :  { %v1049_v0 = vmul.f32 %v1258_v56, %v1048_v62  ;;  %v1063_v1 = vmul.f32 0.01, %v1061_v59 }
 0x16d   :  { %v1050_v4 = vadd.f32 %v1258_v56, %v1049_v0  ;;  %v1065_v18 = vmax.f32 %v1061_v59, %v1063_v1 }
 0x16f   :  { %v1054_v9 = vsel %vm1053_vm0, %v1258_v56, %v1050_v4  ;;  %1067 = vst [vmem:[#allocation2 + $0x48] sm:$0xff] %v1065_v18 }
 0x170   :  { %v1059_v10 = vsel %vm1056_vm1, %v1058_v6, %v1054_v9 }
 0x171   :  { %v1062_v13 = vadd.f32 %v1059_v10, %v998_v7 }
 0x173   :  { %v1064_v5 = vmul.f32 0.01, %v1062_v13 }
 0x175   :  { %v1066_v14 = vmax.f32 %v1062_v13, %v1064_v5 }
 0x177   :  { %1068 = vst [vmem:[#allocation2 + $0x98] sm:$0xff] %v1066_v14 }
 0x178   :  { %1081 = dma.vmem_to_hbm [thread:$0]  %s1074_s6, 2560, %s1076_s9, [#allocation3], %s1295_s10, %s1295_s10, %s1296_s11  }
 0x179   :  { %1283 = dma.done.wait [#allocation3], 2560  }
 0x17a   :  { %1284 = vsyncadd [#allocation3], 4294964736 }
 0x17b   :  { %1086 = vsyncpa [#allocation3], 1 }

</bundles_post_ra>
